<compile_context>
chip_gen: v6e
topology: v6e:2x2x1
jax: 0.10.0
libtpu: 0.0.40
codegen_flags: <defaults>
</compile_context>

<pallas_src>
import functools

import jax
import jax.numpy as jnp
from jax.experimental import pallas as pl
from jax.experimental.pallas import tpu as pltpu


def _adain_kernel(x_ref, g_ref, b_ref, o_ref, *, eps):
    # x_ref: (block_r, HW)  g_ref/b_ref: (block_r, 1)
    x = x_ref[...].astype(jnp.float32)
    mu = jnp.mean(x, axis=-1, keepdims=True)                 # per-row mean (XLU)
    xc = x - mu
    var = jnp.mean(xc * xc, axis=-1, keepdims=True)          # biased var (matches batch_norm training stats)
    scale = g_ref[...].astype(jnp.float32) * jax.lax.rsqrt(var + eps)   # EUP rsqrt
    shift = b_ref[...].astype(jnp.float32)
    o_ref[...] = (xc * scale + shift).astype(o_ref.dtype)


def adaptive_instance_norm_2d(x, weight, bias, *, eps=1e-5,
                              vmem_tile_bytes=4 * 1024 * 1024):
    """Pallas implementation of AdaptiveInstanceNorm2d.forward.

    x:      (B, C, H, W)
    weight: (B*C,)  adaptive gamma (must be assigned before calling, as in PyTorch)
    bias:   (B*C,)  adaptive beta
    """
    B, C, H, W = x.shape
    BC, HW = B * C, H * W

    x2 = x.reshape(BC, HW)                 # rows = instances*channels, lanes = spatial
    g2 = weight.reshape(BC, 1).astype(x.dtype)
    b2 = bias.reshape(BC, 1).astype(x.dtype)

    # Pick as many rows per grid step as fit a ~4 MiB input tile (amortizes the
    # ~0.35 us per-step overhead, keeps double-buffered VMEM well under the
    # per-generation scoped limits, incl. v7x's 64 MiB physical VMEM).
    itemsize = jnp.dtype(x2.dtype).itemsize
    rows = max(1, vmem_tile_bytes // max(1, HW * itemsize))
    if rows >= BC:
        block_r = BC                        # full array dim -> always layout-legal
    else:
        block_r = max(8, (rows // 8) * 8)   # multiple of 8 sublanes
    grid = (pl.cdiv(BC, block_r),)

    kernel = functools.partial(_adain_kernel, eps=float(eps))

    cost = pl.CostEstimate(
        flops=7 * BC * HW,                              # sub, sq, two means, scale, shift
        transcendentals=BC,                             # one rsqrt per (b, c) channel
        bytes_accessed=2 * BC * HW * itemsize + 2 * BC * itemsize,
    )

    out2 = pl.pallas_call(
        kernel,
        out_shape=jax.ShapeDtypeStruct((BC, HW), x.dtype),
        grid_spec=pltpu.PrefetchScalarGridSpec(
            num_scalar_prefetch=0,
            grid=grid,
            in_specs=[
                pl.BlockSpec((block_r, HW), lambda i: (i, 0)),   # x row-tile
                pl.BlockSpec((block_r, 1), lambda i: (i, 0)),    # gamma per row
                pl.BlockSpec((block_r, 1), lambda i: (i, 0)),    # beta per row
            ],
            out_specs=pl.BlockSpec((block_r, HW), lambda i: (i, 0)),
        ),
        compiler_params=pltpu.CompilerParams(
            dimension_semantics=("parallel",),          # row blocks are independent (megacore-shardable)
            vmem_limit_bytes=32 * 1024 * 1024,
        ),
        cost_estimate=cost,
    )(x2, g2, b2)

    return out2.reshape(B, C, H, W)


if __name__ == "__main__":
    key = jax.random.PRNGKey(0)
    k_x, k_w, k_b = jax.random.split(key, 3)

    B, C, H, W = 2, 4, 16, 16
    x = jax.random.normal(k_x, (B, C, H, W), jnp.float32) * 2.0 + 0.5
    # Adaptive params of length B*C, as assigned externally before AdaIN.
    weight = jax.random.normal(k_w, (B * C,), jnp.float32) + 1.0
    bias = jax.random.normal(k_b, (B * C,), jnp.float32)

    out = adaptive_instance_norm_2d(x, weight, bias, eps=1e-5)
    out = jax.block_until_ready(out)

    # Pure-JAX reference of the PyTorch forward:
    #   view (1, B*C, H, W) -> batch_norm(training=True) == per-(b,c) instance norm.
    xf = x.reshape(B * C, H * W)
    mu = xf.mean(axis=-1, keepdims=True)
    var = ((xf - mu) ** 2).mean(axis=-1, keepdims=True)
    ref = (xf - mu) / jnp.sqrt(var + 1e-5) * weight[:, None] + bias[:, None]
    ref = ref.reshape(B, C, H, W)

    assert out.shape == (B, C, H, W)
    assert jnp.allclose(out, ref, atol=1e-4, rtol=1e-4), "mismatch vs reference"

    print("KERNEL_OK")
</pallas_src>

<mosaic_0001>
module attributes {stable_mosaic.version = 11 : i64} {
  func.func @_adain_kernel(%arg0: i32, %arg1: memref<8x256xf32, #tpu.memory_space<vmem>>, %arg2: memref<8x1xf32, #tpu.memory_space<vmem>>, %arg3: memref<8x1xf32, #tpu.memory_space<vmem>>, %arg4: memref<8x256xf32, #tpu.memory_space<vmem>>) attributes {dimension_semantics = [#tpu.dimension_semantics<parallel>], iteration_bounds = array<i64: 1>, scalar_prefetch = 0 : i64, scratch_operands = 0 : i64, tpu.core_type = #tpu.core_type<tc>, window_params = [{transform_indices = @transform_0, window_bounds = array<i64: 8, 256>}, {transform_indices = @transform_1, window_bounds = array<i64: 8, 1>}, {transform_indices = @transform_2, window_bounds = array<i64: 8, 1>}, {transform_indices = @transform_3, window_bounds = array<i64: 8, 256>}]} {
    %c0 = arith.constant 0 : index
    %c0_0 = arith.constant 0 : index
    %0 = vector.load %arg1[%c0, %c0_0] : memref<8x256xf32, #tpu.memory_space<vmem>>, vector<8x256xf32>
    %cst = arith.constant dense<0.000000e+00> : vector<8xf32>
    %1 = vector.multi_reduction <add>, %0, %cst [1] : vector<8x256xf32> to vector<8xf32>
    %2 = vector.shape_cast %1 : vector<8xf32> to vector<8x1xf32>
    %cst_1 = arith.constant 2.560000e+02 : f32
    %3 = vector.broadcast %cst_1 : f32 to vector<8x1xf32>
    %4 = arith.divf %2, %3 : vector<8x1xf32>
    %5 = vector.broadcast %4 : vector<8x1xf32> to vector<8x256xf32>
    %6 = arith.subf %0, %5 : vector<8x256xf32>
    %7 = arith.mulf %6, %6 : vector<8x256xf32>
    %cst_2 = arith.constant dense<0.000000e+00> : vector<8xf32>
    %8 = vector.multi_reduction <add>, %7, %cst_2 [1] : vector<8x256xf32> to vector<8xf32>
    %9 = vector.shape_cast %8 : vector<8xf32> to vector<8x1xf32>
    %cst_3 = arith.constant 2.560000e+02 : f32
    %10 = vector.broadcast %cst_3 : f32 to vector<8x1xf32>
    %11 = arith.divf %9, %10 : vector<8x1xf32>
    %c0_4 = arith.constant 0 : index
    %c0_5 = arith.constant 0 : index
    %12 = vector.load %arg2[%c0_4, %c0_5] : memref<8x1xf32, #tpu.memory_space<vmem>>, vector<8x1xf32>
    %cst_6 = arith.constant 9.99999974E-6 : f32
    %13 = vector.broadcast %cst_6 : f32 to vector<8x1xf32>
    %14 = arith.addf %11, %13 : vector<8x1xf32>
    %15 = math.rsqrt %14 : vector<8x1xf32>
    %16 = arith.mulf %12, %15 : vector<8x1xf32>
    %c0_7 = arith.constant 0 : index
    %c0_8 = arith.constant 0 : index
    %17 = vector.load %arg3[%c0_7, %c0_8] : memref<8x1xf32, #tpu.memory_space<vmem>>, vector<8x1xf32>
    %18 = vector.broadcast %16 : vector<8x1xf32> to vector<8x256xf32>
    %19 = arith.mulf %6, %18 : vector<8x256xf32>
    %20 = vector.broadcast %17 : vector<8x1xf32> to vector<8x256xf32>
    %21 = arith.addf %19, %20 : vector<8x256xf32>
    %c0_9 = arith.constant 0 : index
    %c0_10 = arith.constant 0 : index
    %22 = vector.load %arg4[%c0_9, %c0_10] : memref<8x256xf32, #tpu.memory_space<vmem>>, vector<8x256xf32>
    tpu.vector_store %arg4[%c0_9, %c0_10], %21 {strides = array<i32>} : memref<8x256xf32, #tpu.memory_space<vmem>>, vector<8x256xf32>,
    return
  }
  func.func @transform_0(%arg0: i32) -> (i32, i32) {
    %c0_i32 = arith.constant 0 : i32
    %c0_i32_0 = arith.constant 0 : i32
    return %arg0, %c0_i32 : i32, i32
  }
  func.func @transform_1(%arg0: i32) -> (i32, i32) {
    %c0_i32 = arith.constant 0 : i32
    %c0_i32_0 = arith.constant 0 : i32
    return %arg0, %c0_i32 : i32, i32
  }
  func.func @transform_2(%arg0: i32) -> (i32, i32) {
    %c0_i32 = arith.constant 0 : i32
    %c0_i32_0 = arith.constant 0 : i32
    return %arg0, %c0_i32 : i32, i32
  }
  func.func @transform_3(%arg0: i32) -> (i32, i32) {
    %c0_i32 = arith.constant 0 : i32
    %c0_i32_0 = arith.constant 0 : i32
    return %arg0, %c0_i32 : i32, i32
  }
}

</mosaic_0001>

<bundles_post_ra>
// kernel: tpu_custom_call.1
= control target key start
LH: loop header
LB: loop body
LE: loop exit
PB: predicated region body
PF: predicated region fallthrough
CT: control target
= control target key end

     0   :  { %s130_s0 = inlined_call_operand.vmem [shape: f32[8,256], index: 0, kind: input, shape index: {}]   ;;  %s131_s1 = inlined_call_operand.vmem [shape: f32[8,1], index: 1, kind: input, shape index: {}]   ;;  %s132_s2 = inlined_call_operand.vmem [shape: f32[8,1], index: 2, kind: input, shape index: {}]   ;;  %s133_s3 = inlined_call_operand.hbm [shape: f32[8,256], index: 3, kind: output, shape index: {}]  }
   0x1   :  { %v15_v0 = vld [vmem:[%s130_s0] sm:$0xff]  ;;  %v16_v1 = vld [vmem:[%s130_s0 + $0x8] sm:$0xff] }
   0x2   :  { %8 = vsyncpa [#allocation3], 0  ;;  %v17_v2 = vadd.f32 %v16_v1, %v15_v0  ;;  %v93_v10 = vmov 0   ;;  %v30_v14 = vld [vmem:[%s131_s1] sm:$0xff]  ;;  %s94_s19 = smov [#allocation2]  }
   0x3   :  { %67 = vset.pattern.permute.xlu1 %v93_v10  ;;  %68 = vset.pattern.permute.xlu0 %v93_v10  ;;  %v34_v17 = vld [vmem:[%s132_s2] sm:$0xff]  ;;  %s57_s20 = sshll.u32 %s94_s19, 4  ;;  %s58_s20 = int_to_ptr.vmem [resolvable:$true] %s57_s20 }
   0x4   :  { %18 = vadd.xlane.f32.xlu0 %v17_v2  ;;  %s71_s1 = scalar_lea.vmem %s58_s20, 256  ;;  %p76_p1 = scmp.lt.s32.totalorder %s58_s20, %s58_s20 }
   0x5   :  { %p72_p0 = scmp.ne.s32.totalorder %s58_s20, %s71_s1  ;;  %p77_p2 = scmp.lt.s32.totalorder %s71_s1, %s71_s1 }
   0x7   :  { %p78_p3 = por %p77_p2, %p76_p1 }
   0x9   :  { %p79_p4 = pnand %p78_p3, %p72_p0 }
  0x8d   :  { %v19_v3 = vpop.xlane.xlu0 %18 }
  0x8e   :  { %v21_v4 = vmul.f32 0.00390625, %v19_v3 }
  0x90   :  { %v22_v5 = vsub.f32 %v15_v0, %v21_v4  ;;  %v23_v6 = vsub.f32 %v16_v1, %v21_v4 }
  0x92   :  { %v24_v7 = vmul.f32 %v22_v5, %v22_v5  ;;  %v25_v8 = vmul.f32 %v23_v6, %v23_v6 }
  0x94   :  { %v26_v9 = vadd.f32 %v25_v8, %v24_v7 }
  0x96   :  { %27 = vadd.xlane.f32.xlu0 %v26_v9 }
 0x11f   :  { %v28_v11 = vpop.xlane.xlu0 %27 }
 0x120   :  { %v29_v12 = vmul.f32 0.00390625, %v28_v11 }
 0x122   :  { %v31_v13 = vadd.f32 1e-05, %v29_v12 }
 0x124   :  { %69 = vrsqrt.f32 %v31_v13 }
 0x131   :  { %v70_v15 = vpop.eup %69 }
 0x132   :  { %v33_v16 = vmul.f32 %v70_v15, %v30_v14 }
 0x134   :  { %37 = vperm.xlu1 %67, %v33_v16  }
 0x138   :  { %44 = vperm.xlu1 %67, %v34_v17  }
 0x1af   :  { %v38_v18 = vpop.permute.xlu1 %37 }
 0x1b0   :  { %v40_v19 = vmul.f32 %v38_v18, %v22_v5  ;;  %v41_v20 = vmul.f32 %v38_v18, %v23_v6 }
 0x1b3   :  { %v45_v21 = vpop.permute.xlu1 %44 }
 0x1b4   :  { %v47_v22 = vadd.f32 %v45_v21, %v40_v19  ;;  %v48_v23 = vadd.f32 %v45_v21, %v41_v20 }
 0x1b6   :  { %49 = vst [vmem:[#allocation2] sm:$0xff] %v47_v22  ;;  %50 = vst [vmem:[#allocation2 + $0x8] sm:$0xff] %v48_v23 }
 0x1b7   :  { %82 = shalt.err (!%p79_p4)
}
 0x1b8   :  { %60 = dma.vmem_to_hbm [thread:$0]  %s58_s20, 256, %s133_s3, [#allocation3]  }
 0x1b9   :  { %91 = dma.done.wait [#allocation3], 256  }
 0x1ba   :  { %92 = vsyncadd [#allocation3], 4294967040 }
 0x1bb   :  { %64 = vsyncpa [#allocation3], 1 }

</bundles_post_ra>
